<compile_context>
chip_gen: v7x
topology: tpu7x:2x2x1
jax: 0.10.0
libtpu: 0.0.40
codegen_flags: <defaults>
</compile_context>

<pallas_src>
import jax
import jax.numpy as jnp
from jax.experimental import pallas as pl
from jax.experimental.pallas import tpu as pltpu


# ---------------------------------------------------------------------------
# Kernel
# ---------------------------------------------------------------------------
def gat_dagnn_kernel(q_ref, k_ref, v_ref, adj_ref, sm_ref,
                     wq_ref, wk_ref, blin_ref, wr0t_ref, wr1t_ref,
                     attw_ref, atts_ref):
    # Upcast after the DMA: HBM traffic stays in the narrow input dtype, all
    # score / softmax / accumulation math runs in f32.
    q = q_ref[...].astype(jnp.float32)          # (BB, H)
    k = k_ref[...].astype(jnp.float32)          # (BB, N, H)
    v = v_ref[...].astype(jnp.float32)          # (BB, N, H)
    adj = adj_ref[...]                          # (BB, N) f32
    sm = sm_ref[...]                            # (BB, N) f32
    wq = wq_ref[...]                            # (1, H)
    wk = wk_ref[...]                            # (1, H)

    # alpha[b, n] = Q[b]·wq + K[b, n]·wk + b_lin  (== linear(concat(Q, K_n)))
    score_q = jnp.sum(q * wq, axis=-1, keepdims=True)            # (BB, 1)
    score_k = jnp.sum(k * wk[None, :, :], axis=-1)               # (BB, N)
    alpha = score_k + score_q + blin_ref[...]                    # (BB, N)

    # mask_logic: alpha - (1 - adj) * 1e30
    alpha = alpha - (1.0 - adj) * 1e30

    # softmax over N (reciprocal + multiply instead of full-width divide)
    m = jnp.max(alpha, axis=-1, keepdims=True)
    e = jnp.exp(alpha - m)
    denom = jnp.sum(e, axis=-1, keepdims=True)
    attw = e * pl.reciprocal(denom, approx=False)                # (BB, N)

    # attn_sum = attw @ (V@Wr0^T * s + V@Wr1^T * (1-s))
    #          = ((attw*s) @ V) @ Wr0^T + ((attw*(1-s)) @ V) @ Wr1^T
    # Pooling as batched matmuls: no (BB, N, H) f32 temporaries, no relayout.
    w0 = attw * sm                                               # (BB, N)
    w1 = attw - w0                                               # attw * (1 - sm)
    r0 = jnp.einsum('bkn,bnh->bkh', w0[:, None, :], v,
                    preferred_element_type=jnp.float32)[:, 0, :]  # (BB, H)
    r1 = jnp.einsum('bkn,bnh->bkh', w1[:, None, :], v,
                    preferred_element_type=jnp.float32)[:, 0, :]  # (BB, H)
    atts = (jnp.dot(r0, wr0t_ref[...], preferred_element_type=jnp.float32) +
            jnp.dot(r1, wr1t_ref[...], preferred_element_type=jnp.float32))

    attw_ref[...] = attw
    atts_ref[...] = atts.astype(atts_ref.dtype)


# ---------------------------------------------------------------------------
# Block-size selection (honest, layout-aware VMEM accounting)
# ---------------------------------------------------------------------------
def _round_up(x, m):
    return -(-x // m) * m


def _vmem_capacity_bytes():
    """Per-core VMEM capacity; conservative fallback if the query fails."""
    try:
        return int(pltpu.get_tpu_info().vmem_capacity_bytes)
    except Exception:
        return 64 * 1024 * 1024   # v7x per-TensorCore size (worst case)


def _block_vmem_bytes(bb, N, H, in_itemsize):
    """VMEM footprint of one grid step, with (8,128) layout padding,
    double-buffered I/O blocks and headroom for elementwise temporaries."""
    Hp = _round_up(H, 128)        # lane-padded H
    Np_lane = _round_up(N, 128)   # N as a lane dim (adj/s_mask/attn_weight)
    Np_sub = _round_up(N, 8)      # N as a sublane dim (K/V blocks)
    bbp = _round_up(bb, 8)

    kv_blk = bb * Np_sub * Hp * in_itemsize          # one K or V block
    q_blk = bbp * Hp * in_itemsize
    mask_blk = bbp * Np_lane * 4                     # adj / s_mask (f32)
    out_w = bbp * Np_lane * 4                        # attn_weight block
    out_s = bbp * Hp * 4                             # attn_sum block
    w_const = (2 * 8 * Hp                            # wq, wk
               + 8 * 128                             # bias
               + 2 * _round_up(H, 8) * Hp) * 4       # Wr0^T, Wr1^T

    dbl = 2 * (q_blk + 2 * kv_blk + 2 * mask_blk + out_w + out_s + w_const)
    tmp = 3 * bb * Np_sub * Hp * 4                   # f32 elementwise temporaries
    return dbl + tmp


def _choose_batch_block(B, N, H, budget_bytes, in_itemsize, multi_core):
    """Largest divisor of B whose block fits the VMEM budget.

    Divisor choice means no wrapper-side padding (and no padded K/V copies in
    HBM).  On multi-TensorCore chips (v7x) prefer an even grid length >= 4 so
    both cores get >= 2 pipelined blocks; on single-TC chips run one maximal
    block if it fits.
    """
    def fits(d):
        return _block_vmem_bytes(d, N, H, in_itemsize) <= budget_bytes

    divs = sorted((d for d in range(1, B + 1) if B % d == 0), reverse=True)
    aligned = [d for d in divs if d == B or d % 8 == 0]   # sublane-friendly blocks
    pool = aligned if aligned else divs

    fitting = [d for d in pool if fits(d)]
    if not fitting:
        fitting = [d for d in divs if fits(d)] or [1]

    if multi_core and B >= 4:
        pref = [d for d in fitting if (B // d) >= 4 and (B // d) % 2 == 0]
        if not pref:
            pref = [d for d in fitting if (B // d) >= 2]
        if pref:
            return int(pref[0])
    return int(fitting[0])


# ---------------------------------------------------------------------------
# Wrapper
# ---------------------------------------------------------------------------
def gat_dagnn_forward(Q, K, V, adj, s_mask, params, kv_dtype=None):
    """Pallas implementation of GAT_dagnn.forward.

    Returns (attn_weight (B,1,N), attn_sum (B,H)), matching the torch module.
    Set kv_dtype=jnp.bfloat16 to halve Q/K/V HBM traffic (relax tolerances).
    """
    B, N, H = K.shape
    w_lin = params["w_lin"].astype(jnp.float32)           # (1, 2H)
    b_lin = params["b_lin"].astype(jnp.float32)           # (1,)

    wq = w_lin[:, :H]                                      # (1, H)
    wk = w_lin[:, H:]                                      # (1, H)
    blin = b_lin.reshape(1, 1)                             # (1, 1)
    wr0t = params["Wr0"].T.astype(jnp.float32)             # (H, H)
    wr1t = params["Wr1"].T.astype(jnp.float32)             # (H, H)

    # Q/K/V stay in their native dtype in HBM (upcast happens in-kernel).
    if kv_dtype is not None:
        Q = Q.astype(kv_dtype)
        K = K.astype(kv_dtype)
        V = V.astype(kv_dtype)
    adj_f = adj.astype(jnp.float32).reshape(B, N)
    sm_f = s_mask.astype(jnp.float32).reshape(B, N)

    # Generation-aware VMEM policy.
    vmem_cap = _vmem_capacity_bytes()
    vmem_limit = max(32 * 1024 * 1024,
                     min((vmem_cap * 3) // 4, 112 * 1024 * 1024))
    multi_core = vmem_cap < 100 * 1024 * 1024   # small per-core VMEM => v7x (2 TCs)
    in_itemsize = jnp.dtype(K.dtype).itemsize

    BB = _choose_batch_block(B, N, H, int(vmem_limit * 0.8), in_itemsize,
                             multi_core)
    grid = (B // BB,)

    out_shape = (
        jax.ShapeDtypeStruct((B, N), jnp.float32),   # attn_weight (2-D slab)
        jax.ShapeDtypeStruct((B, H), jnp.float32),   # attn_sum
    )

    grid_spec = pltpu.PrefetchScalarGridSpec(
        num_scalar_prefetch=0,
        grid=grid,
        in_specs=[
            pl.BlockSpec((BB, H), lambda b: (b, 0)),        # Q
            pl.BlockSpec((BB, N, H), lambda b: (b, 0, 0)),  # K
            pl.BlockSpec((BB, N, H), lambda b: (b, 0, 0)),  # V
            pl.BlockSpec((BB, N), lambda b: (b, 0)),        # adj
            pl.BlockSpec((BB, N), lambda b: (b, 0)),        # s_mask
            pl.BlockSpec((1, H), lambda b: (0, 0)),         # wq (block-resident)
            pl.BlockSpec((1, H), lambda b: (0, 0)),         # wk
            pl.BlockSpec((1, 1), lambda b: (0, 0)),         # linear bias
            pl.BlockSpec((H, H), lambda b: (0, 0)),         # Wr0^T
            pl.BlockSpec((H, H), lambda b: (0, 0)),         # Wr1^T
        ],
        out_specs=[
            pl.BlockSpec((BB, N), lambda b: (b, 0)),        # attn_weight
            pl.BlockSpec((BB, H), lambda b: (b, 0)),        # attn_sum
        ],
    )

    attw2d, atts = pl.pallas_call(
        gat_dagnn_kernel,
        out_shape=out_shape,
        grid_spec=grid_spec,
        compiler_params=pltpu.CompilerParams(
            dimension_semantics=("parallel",),
            vmem_limit_bytes=int(vmem_limit)),
    )(Q, K, V, adj_f, sm_f, wq, wk, blin, wr0t, wr1t)

    attn_weight = attw2d.reshape(B, 1, N)
    attn_sum = atts
    return attn_weight, attn_sum


# ---------------------------------------------------------------------------
# Pure-JAX reference (mirrors the torch module exactly)
# ---------------------------------------------------------------------------
def gat_dagnn_reference(Q, K, V, adj, s_mask, params):
    B, N, H = K.shape
    Qe = jnp.broadcast_to(Q[:, None, :], (B, N, H))
    X = jnp.concatenate([Qe, K], axis=2)                       # (B, N, 2H)
    alpha = (X @ params["w_lin"].T + params["b_lin"])          # (B, N, 1)
    alpha = jnp.transpose(alpha, (0, 2, 1))                    # (B, 1, N)
    alpha = alpha - (1.0 - adj[:, None, :].astype(jnp.float32)) * 1e30
    attw = jax.nn.softmax(alpha, axis=2)
    V0 = V @ params["Wr0"].T
    V1 = V @ params["Wr1"].T
    s = s_mask.astype(jnp.float32)[:, :, None]
    Vm = V0 * s + V1 * (1.0 - s)
    atts = jnp.einsum("bon,bnh->boh", attw, Vm)[:, 0, :]
    return attw, atts


def init_params(key, hidden_size):
    """Deterministic init matching nn.Linear shapes (uniform, torch-like bounds)."""
    H = hidden_size
    k1, k2, k3, k4 = jax.random.split(key, 4)
    lim_lin = 1.0 / jnp.sqrt(2.0 * H)
    lim_wr = 1.0 / jnp.sqrt(1.0 * H)
    return {
        "w_lin": jax.random.uniform(k1, (1, 2 * H), jnp.float32, -lim_lin, lim_lin),
        "b_lin": jax.random.uniform(k2, (1,), jnp.float32, -lim_lin, lim_lin),
        "Wr0": jax.random.uniform(k3, (H, H), jnp.float32, -lim_wr, lim_wr),
        "Wr1": jax.random.uniform(k4, (H, H), jnp.float32, -lim_wr, lim_wr),
    }


if __name__ == "__main__":
    B, N, H = 2, 8, 32

    key = jax.random.PRNGKey(0)
    kq, kk, kv, ka, ks, kp = jax.random.split(key, 6)

    Q = jax.random.normal(kq, (B, H), jnp.float32)
    K = jax.random.normal(kk, (B, N, H), jnp.float32)
    V = jax.random.normal(kv, (B, N, H), jnp.float32)
    adj = (jax.random.uniform(ka, (B, N)) > 0.3).astype(jnp.float32)
    s_mask = (jax.random.uniform(ks, (B, N)) > 0.5).astype(jnp.float32)
    params = init_params(kp, H)

    attw, atts = gat_dagnn_forward(Q, K, V, adj, s_mask, params)
    jax.block_until_ready((attw, atts))

    attw_ref, atts_ref = gat_dagnn_reference(Q, K, V, adj, s_mask, params)

    assert attw.shape == (B, 1, N) and atts.shape == (B, H)
    assert jnp.allclose(attw, attw_ref, atol=1e-5, rtol=1e-5)
    assert jnp.allclose(atts, atts_ref, atol=1e-5, rtol=1e-5)

    print("KERNEL_OK")
</pallas_src>

<mosaic_0001>
module attributes {stable_mosaic.version = 11 : i64} {
  func.func @gat_dagnn_kernel(%arg0: i32, %arg1: memref<2x32xf32, #tpu.memory_space<vmem>>, %arg2: memref<2x8x32xf32, #tpu.memory_space<vmem>>, %arg3: memref<2x8x32xf32, #tpu.memory_space<vmem>>, %arg4: memref<2x8xf32, #tpu.memory_space<vmem>>, %arg5: memref<2x8xf32, #tpu.memory_space<vmem>>, %arg6: memref<1x32xf32, #tpu.memory_space<vmem>>, %arg7: memref<1x32xf32, #tpu.memory_space<vmem>>, %arg8: memref<1x1xf32, #tpu.memory_space<vmem>>, %arg9: memref<32x32xf32, #tpu.memory_space<vmem>>, %arg10: memref<32x32xf32, #tpu.memory_space<vmem>>, %arg11: memref<2x8xf32, #tpu.memory_space<vmem>>, %arg12: memref<2x32xf32, #tpu.memory_space<vmem>>) attributes {dimension_semantics = [#tpu.dimension_semantics<parallel>], iteration_bounds = array<i64: 1>, scalar_prefetch = 0 : i64, scratch_operands = 0 : i64, tpu.core_type = #tpu.core_type<tc>, window_params = [{transform_indices = @transform_0, window_bounds = array<i64: 2, 32>}, {transform_indices = @transform_1, window_bounds = array<i64: 2, 8, 32>}, {transform_indices = @transform_2, window_bounds = array<i64: 2, 8, 32>}, {transform_indices = @transform_3, window_bounds = array<i64: 2, 8>}, {transform_indices = @transform_4, window_bounds = array<i64: 2, 8>}, {pipeline_mode = #tpu.pipeline_mode<synchronous>, transform_indices = @transform_5, window_bounds = array<i64: 1, 32>}, {pipeline_mode = #tpu.pipeline_mode<synchronous>, transform_indices = @transform_6, window_bounds = array<i64: 1, 32>}, {pipeline_mode = #tpu.pipeline_mode<synchronous>, transform_indices = @transform_7, window_bounds = array<i64: 1, 1>}, {pipeline_mode = #tpu.pipeline_mode<synchronous>, transform_indices = @transform_8, window_bounds = array<i64: 32, 32>}, {pipeline_mode = #tpu.pipeline_mode<synchronous>, transform_indices = @transform_9, window_bounds = array<i64: 32, 32>}, {transform_indices = @transform_10, window_bounds = array<i64: 2, 8>}, {transform_indices = @transform_11, window_bounds = array<i64: 2, 32>}]} {
    %c0 = arith.constant 0 : index
    %c0_0 = arith.constant 0 : index
    %0 = vector.load %arg1[%c0, %c0_0] : memref<2x32xf32, #tpu.memory_space<vmem>>, vector<2x32xf32>
    %c0_1 = arith.constant 0 : index
    %c0_2 = arith.constant 0 : index
    %c0_3 = arith.constant 0 : index
    %1 = vector.load %arg2[%c0_1, %c0_2, %c0_3] : memref<2x8x32xf32, #tpu.memory_space<vmem>>, vector<2x8x32xf32>
    %c0_4 = arith.constant 0 : index
    %c0_5 = arith.constant 0 : index
    %c0_6 = arith.constant 0 : index
    %2 = vector.load %arg3[%c0_4, %c0_5, %c0_6] : memref<2x8x32xf32, #tpu.memory_space<vmem>>, vector<2x8x32xf32>
    %c0_7 = arith.constant 0 : index
    %c0_8 = arith.constant 0 : index
    %3 = vector.load %arg4[%c0_7, %c0_8] : memref<2x8xf32, #tpu.memory_space<vmem>>, vector<2x8xf32>
    %c0_9 = arith.constant 0 : index
    %c0_10 = arith.constant 0 : index
    %4 = vector.load %arg5[%c0_9, %c0_10] : memref<2x8xf32, #tpu.memory_space<vmem>>, vector<2x8xf32>
    %c0_11 = arith.constant 0 : index
    %c0_12 = arith.constant 0 : index
    %5 = vector.load %arg6[%c0_11, %c0_12] : memref<1x32xf32, #tpu.memory_space<vmem>>, vector<1x32xf32>
    %c0_13 = arith.constant 0 : index
    %c0_14 = arith.constant 0 : index
    %6 = vector.load %arg7[%c0_13, %c0_14] : memref<1x32xf32, #tpu.memory_space<vmem>>, vector<1x32xf32>
    %7 = vector.broadcast %5 : vector<1x32xf32> to vector<2x32xf32>
    %8 = arith.mulf %0, %7 : vector<2x32xf32>
    %cst = arith.constant dense<0.000000e+00> : vector<2xf32>
    %9 = vector.multi_reduction <add>, %8, %cst [1] : vector<2x32xf32> to vector<2xf32>
    %10 = vector.shape_cast %9 : vector<2xf32> to vector<2x1xf32>
    %11 = vector.shape_cast %6 : vector<1x32xf32> to vector<1x1x32xf32>
    %12 = vector.broadcast %11 : vector<1x1x32xf32> to vector<2x8x32xf32>
    %13 = arith.mulf %1, %12 : vector<2x8x32xf32>
    %cst_15 = arith.constant dense<0.000000e+00> : vector<2x8xf32>
    %14 = vector.multi_reduction <add>, %13, %cst_15 [2] : vector<2x8x32xf32> to vector<2x8xf32>
    %15 = vector.broadcast %10 : vector<2x1xf32> to vector<2x8xf32>
    %16 = arith.addf %14, %15 : vector<2x8xf32>
    %c0_16 = arith.constant 0 : index
    %c0_17 = arith.constant 0 : index
    %17 = vector.load %arg8[%c0_16, %c0_17] : memref<1x1xf32, #tpu.memory_space<vmem>>, vector<1x1xf32>
    %18 = vector.broadcast %17 : vector<1x1xf32> to vector<2x8xf32>
    %19 = arith.addf %16, %18 : vector<2x8xf32>
    %cst_18 = arith.constant 1.000000e+00 : f32
    %20 = vector.broadcast %cst_18 : f32 to vector<2x8xf32>
    %21 = arith.subf %20, %3 : vector<2x8xf32>
    %cst_19 = arith.constant 1.000000e+30 : f32
    %22 = vector.broadcast %cst_19 : f32 to vector<2x8xf32>
    %23 = arith.mulf %21, %22 : vector<2x8xf32>
    %24 = arith.subf %19, %23 : vector<2x8xf32>
    %cst_20 = arith.constant dense<0xFF800000> : vector<2xf32>
    %25 = vector.multi_reduction <maximumf>, %24, %cst_20 [1] : vector<2x8xf32> to vector<2xf32>
    %26 = vector.shape_cast %25 : vector<2xf32> to vector<2x1xf32>
    %27 = vector.broadcast %26 : vector<2x1xf32> to vector<2x8xf32>
    %28 = arith.subf %24, %27 : vector<2x8xf32>
    %29 = math.exp %28 : vector<2x8xf32>
    %cst_21 = arith.constant dense<0.000000e+00> : vector<2xf32>
    %30 = vector.multi_reduction <add>, %29, %cst_21 [1] : vector<2x8xf32> to vector<2xf32>
    %31 = vector.shape_cast %30 : vector<2xf32> to vector<2x1xf32>
    %32 = tpu.reciprocal %31 : vector<2x1xf32> -> vector<2x1xf32>
    %33 = vector.broadcast %32 : vector<2x1xf32> to vector<2x8xf32>
    %34 = arith.mulf %29, %33 : vector<2x8xf32>
    %35 = arith.mulf %34, %4 : vector<2x8xf32>
    %36 = arith.subf %34, %35 : vector<2x8xf32>
    %37 = vector.shape_cast %35 : vector<2x8xf32> to vector<2x1x8xf32>
    "tpu.trace_start"() <{level = 10 : i32, message = "bkn,bnh->bkh"}> : () -> ()
    %cst_22 = arith.constant dense<0.000000e+00> : vector<2x1x32xf32>
    %38 = tpu.matmul %37, %2, %cst_22 {dimension_numbers = #tpu.dot_dimension_numbers<[2], [1], [1], [2], [0, 0, 0, 1, 1, 2], [0], [0]>} : vector<2x1x8xf32>, vector<2x8x32xf32>, vector<2x1x32xf32> -> vector<2x1x32xf32>
    "tpu.trace_stop"() : () -> ()
    %39 = vector.shape_cast %38 : vector<2x1x32xf32> to vector<2x32xf32>
    %40 = vector.shape_cast %36 : vector<2x8xf32> to vector<2x1x8xf32>
    "tpu.trace_start"() <{level = 10 : i32, message = "bkn,bnh->bkh"}> : () -> ()
    %cst_23 = arith.constant dense<0.000000e+00> : vector<2x1x32xf32>
    %41 = tpu.matmul %40, %2, %cst_23 {dimension_numbers = #tpu.dot_dimension_numbers<[2], [1], [1], [2], [0, 0, 0, 1, 1, 2], [0], [0]>} : vector<2x1x8xf32>, vector<2x8x32xf32>, vector<2x1x32xf32> -> vector<2x1x32xf32>
    "tpu.trace_stop"() : () -> ()
    %42 = vector.shape_cast %41 : vector<2x1x32xf32> to vector<2x32xf32>
    %c0_24 = arith.constant 0 : index
    %c0_25 = arith.constant 0 : index
    %43 = vector.load %arg9[%c0_24, %c0_25] : memref<32x32xf32, #tpu.memory_space<vmem>>, vector<32x32xf32>
    %cst_26 = arith.constant dense<0.000000e+00> : vector<2x32xf32>
    %44 = tpu.matmul %39, %43, %cst_26 {dimension_numbers = #tpu.dot_dimension_numbers<[1], [0], [0], [1], [0, 0, 1, 1], [], []>} : vector<2x32xf32>, vector<32x32xf32>, vector<2x32xf32> -> vector<2x32xf32>
    %c0_27 = arith.constant 0 : index
    %c0_28 = arith.constant 0 : index
    %45 = vector.load %arg10[%c0_27, %c0_28] : memref<32x32xf32, #tpu.memory_space<vmem>>, vector<32x32xf32>
    %cst_29 = arith.constant dense<0.000000e+00> : vector<2x32xf32>
    %46 = tpu.matmul %42, %45, %cst_29 {dimension_numbers = #tpu.dot_dimension_numbers<[1], [0], [0], [1], [0, 0, 1, 1], [], []>} : vector<2x32xf32>, vector<32x32xf32>, vector<2x32xf32> -> vector<2x32xf32>
    %47 = arith.addf %44, %46 : vector<2x32xf32>
    %c0_30 = arith.constant 0 : index
    %c0_31 = arith.constant 0 : index
    %48 = vector.load %arg11[%c0_30, %c0_31] : memref<2x8xf32, #tpu.memory_space<vmem>>, vector<2x8xf32>
    tpu.vector_store %arg11[%c0_30, %c0_31], %34 {strides = array<i32>} : memref<2x8xf32, #tpu.memory_space<vmem>>, vector<2x8xf32>,
    %c0_32 = arith.constant 0 : index
    %c0_33 = arith.constant 0 : index
    %49 = vector.load %arg12[%c0_32, %c0_33] : memref<2x32xf32, #tpu.memory_space<vmem>>, vector<2x32xf32>
    tpu.vector_store %arg12[%c0_32, %c0_33], %47 {strides = array<i32>} : memref<2x32xf32, #tpu.memory_space<vmem>>, vector<2x32xf32>,
    return
  }
  func.func @transform_0(%arg0: i32) -> (i32, i32) {
    %c0_i32 = arith.constant 0 : i32
    %c0_i32_0 = arith.constant 0 : i32
    return %arg0, %c0_i32 : i32, i32
  }
  func.func @transform_1(%arg0: i32) -> (i32, i32, i32) {
    %c0_i32 = arith.constant 0 : i32
    %c0_i32_0 = arith.constant 0 : i32
    %c0_i32_1 = arith.constant 0 : i32
    return %arg0, %c0_i32, %c0_i32_0 : i32, i32, i32
  }
  func.func @transform_2(%arg0: i32) -> (i32, i32, i32) {
    %c0_i32 = arith.constant 0 : i32
    %c0_i32_0 = arith.constant 0 : i32
    %c0_i32_1 = arith.constant 0 : i32
    return %arg0, %c0_i32, %c0_i32_0 : i32, i32, i32
  }
  func.func @transform_3(%arg0: i32) -> (i32, i32) {
    %c0_i32 = arith.constant 0 : i32
    %c0_i32_0 = arith.constant 0 : i32
    return %arg0, %c0_i32 : i32, i32
  }
  func.func @transform_4(%arg0: i32) -> (i32, i32) {
    %c0_i32 = arith.constant 0 : i32
    %c0_i32_0 = arith.constant 0 : i32
    return %arg0, %c0_i32 : i32, i32
  }
  func.func @transform_5(%arg0: i32) -> (i32, i32) {
    %c0_i32 = arith.constant 0 : i32
    %c0_i32_0 = arith.constant 0 : i32
    %c0_i32_1 = arith.constant 0 : i32
    return %c0_i32, %c0_i32_0 : i32, i32
  }
  func.func @transform_6(%arg0: i32) -> (i32, i32) {
    %c0_i32 = arith.constant 0 : i32
    %c0_i32_0 = arith.constant 0 : i32
    %c0_i32_1 = arith.constant 0 : i32
    return %c0_i32, %c0_i32_0 : i32, i32
  }
  func.func @transform_7(%arg0: i32) -> (i32, i32) {
    %c0_i32 = arith.constant 0 : i32
    %c0_i32_0 = arith.constant 0 : i32
    %c0_i32_1 = arith.constant 0 : i32
    return %c0_i32, %c0_i32_0 : i32, i32
  }
  func.func @transform_8(%arg0: i32) -> (i32, i32) {
    %c0_i32 = arith.constant 0 : i32
    %c0_i32_0 = arith.constant 0 : i32
    %c0_i32_1 = arith.constant 0 : i32
    return %c0_i32, %c0_i32_0 : i32, i32
  }
  func.func @transform_9(%arg0: i32) -> (i32, i32) {
    %c0_i32 = arith.constant 0 : i32
    %c0_i32_0 = arith.constant 0 : i32
    %c0_i32_1 = arith.constant 0 : i32
    return %c0_i32, %c0_i32_0 : i32, i32
  }
  func.func @transform_10(%arg0: i32) -> (i32, i32) {
    %c0_i32 = arith.constant 0 : i32
    %c0_i32_0 = arith.constant 0 : i32
    return %arg0, %c0_i32 : i32, i32
  }
  func.func @transform_11(%arg0: i32) -> (i32, i32) {
    %c0_i32 = arith.constant 0 : i32
    %c0_i32_0 = arith.constant 0 : i32
    return %arg0, %c0_i32 : i32, i32
  }
}

</mosaic_0001>

<bundles_post_ra>
// kernel: tpu_custom_call.1
= control target key start
LH: loop header
LB: loop body
LE: loop exit
PB: predicated region body
PF: predicated region fallthrough
CT: control target
= control target key end

     0   :  { %s1415_s0 = inlined_call_operand.vmem [shape: f32[2,32], index: 0, kind: input, shape index: {}]   ;;  %s1416_s1 = inlined_call_operand.hbm [shape: f32[2,8,32], index: 1, kind: input, shape index: {}]   ;;  %s1417_s2 = inlined_call_operand.hbm [shape: f32[2,8,32], index: 2, kind: input, shape index: {}]   ;;  %s1418_s3 = inlined_call_operand.hbm [shape: f32[2,8], index: 3, kind: input, shape index: {}]   ;;  %s1419_s4 = inlined_call_operand.hbm [shape: f32[2,8], index: 4, kind: input, shape index: {}]   ;;  %s1420_s5 = inlined_call_operand.hbm [shape: f32[1,32], index: 5, kind: input, shape index: {}]   ;;  %s1421_s6 = inlined_call_operand.hbm [shape: f32[1,32], index: 6, kind: input, shape index: {}]   ;;  %s1422_s7 = inlined_call_operand.<no memory space> [shape: f32[1,1], index: 7, kind: input, shape index: {}]   ;;  %s1423_s8 = inlined_call_operand.hbm [shape: f32[32,32], index: 8, kind: input, shape index: {}]   ;;  %s1424_s9 = inlined_call_operand.vmem [shape: f32[32,32], index: 9, kind: input, shape index: {}]   ;;  %s1425_s10 = inlined_call_operand.hbm [shape: f32[2,8], index: 10, kind: output, shape index: {0}]   ;;  %s1426_s11 = inlined_call_operand.hbm [shape: f32[2,32], index: 11, kind: output, shape index: {1}]  }
   0x1   :  { %v17_v0 = vstv %s1422_s7 }
   0x2   :  { %18 = vst [vmem:[#allocation2] sm:$0x1] %v17_v0 }
   0x3   :  { %19 = vsyncpa [#allocation4], 0 }
   0x4   :  { %20 = vsyncpa [#allocation7], 0 }
   0x5   :  { %21 = vsyncpa [#allocation10], 0 }
   0x6   :  { %22 = vsyncpa [#allocation13], 0 }
   0x7   :  { %23 = vsyncpa [#allocation5], 0 }
   0x8   :  { %24 = vsyncpa [#allocation17], 0  ;;  %s1155_s19 = smov [#allocation6]   ;;  %s1156_s21 = smov [#allocation9]  }
   0x9   :  { %s44_s20 = sshll.u32 %s1155_s19, 4  ;;  %s67_s22 = sshll.u32 %s1156_s21, 4  ;;  %s45_s20 = int_to_ptr.vmem [resolvable:$true] %s44_s20  ;;  %s68_s22 = int_to_ptr.vmem [resolvable:$true] %s67_s22 }
   0xa   :  { %s945_s25 = scalar_lea.hbm %s1417_s2, 256 }
   0xb   :  { %p946_p0 = scmp.ne.s32.totalorder %s1417_s2, %s945_s25  ;;  %p949_p1 = scmp.lt.u32.totalorder %s945_s25, %s1417_s2 }
   0xd   :  { %p951_p2 = pnand %p949_p1, %p946_p0 }
   0xf   :  { %954 = shalt.err (!%p951_p2)
}
  0x10   :  { %s955_s29 = scalar_lea.vmem %s45_s20, 256  ;;  %p960_p4 = scmp.lt.s32.totalorder %s45_s20, %s45_s20 }
  0x11   :  { %p956_p3 = scmp.ne.s32.totalorder %s45_s20, %s955_s29  ;;  %p961_p5 = scmp.lt.s32.totalorder %s955_s29, %s955_s29 }
  0x13   :  { %p962_p6 = por %p961_p5, %p960_p4 }
  0x15   :  { %p963_p7 = pnand %p962_p6, %p956_p3 }
  0x17   :  { %966 = shalt.err (!%p963_p7)
}
  0x18   :  { %s1157_s30 = smov 128   ;;  %s1158_s12 = smov 8  }
  0x19   :  { %50 = dma.hbm_to_vmem [thread:$0]  %s1417_s2, 256, %s45_s20, [#allocation7], %s1157_s30, %s1157_s30, %s1158_s12  }
  0x1a   :  { %s967_s17 = scalar_lea.hbm %s1419_s4, 32 }
  0x1b   :  { %p968_p8 = scmp.ne.s32.totalorder %s1419_s4, %s967_s17  ;;  %p971_p9 = scmp.lt.u32.totalorder %s967_s17, %s1419_s4 }
  0x1d   :  { %p973_p10 = pnand %p971_p9, %p968_p8 }
  0x1f   :  { %976 = shalt.err (!%p973_p10)
}
  0x20   :  { %s977_s24 = scalar_lea.vmem %s68_s22, 32  ;;  %p982_p12 = scmp.lt.s32.totalorder %s68_s22, %s68_s22 }
  0x21   :  { %p978_p11 = scmp.ne.s32.totalorder %s68_s22, %s977_s24  ;;  %p983_p13 = scmp.lt.s32.totalorder %s977_s24, %s977_s24 }
  0x23   :  { %p984_p0 = por %p983_p13, %p982_p12 }
  0x25   :  { %p985_p1 = pnand %p984_p0, %p978_p11 }
  0x27   :  { %988 = shalt.err (!%p985_p1)
}
  0x28   :  { %70 = dma.hbm_to_vmem [thread:$0]  %s1419_s4, 32, %s68_s22, [#allocation10]  }
  0x29   :  { %s1159_s25 = smov [#allocation12]   ;;  %s1160_s27 = smov [#allocation3]  }
  0x2a   :  { %s87_s26 = sshll.u32 %s1159_s25, 4  ;;  %s32_s7 = sshll.u32 %s1160_s27, 4  ;;  %s88_s26 = int_to_ptr.vmem [resolvable:$true] %s87_s26  ;;  %s1260_s7 = int_to_ptr.vmem [resolvable:$true] %s32_s7 }
  0x2b   :  { %s989_s13 = scalar_lea.hbm %s1421_s6, 16 }
  0x2c   :  { %p990_p2 = scmp.ne.s32.totalorder %s1421_s6, %s989_s13  ;;  %p993_p3 = scmp.lt.u32.totalorder %s989_s13, %s1421_s6 }
  0x2e   :  { %p995_p4 = pnand %p993_p3, %p990_p2 }
  0x30   :  { %998 = shalt.err (!%p995_p4)
}
  0x31   :  { %s999_s4 = scalar_lea.vmem %s88_s26, 16  ;;  %s1003_s22 = scalar_lea.vmem %s88_s26, 32 }
  0x32   :  { %p1000_p5 = scmp.ne.s32.totalorder %s88_s26, %s999_s4  ;;  %p1004_p6 = scmp.lt.s32.totalorder %s88_s26, %s88_s26 }
  0x33   :  { %p1005_p7 = scmp.lt.s32.totalorder %s1003_s22, %s999_s4 }
  0x35   :  { %p1006_p8 = por %p1005_p7, %p1004_p6 }
  0x37   :  { %p1007_p9 = pnand %p1006_p8, %p1000_p5 }
  0x39   :  { %1010 = shalt.err (!%p1007_p9)
}
  0x3a   :  { %90 = dma.hbm_to_vmem [thread:$0]  %s1421_s6, 16, %s88_s26, [#allocation13]  }
  0x3b   :  { %s1011_s24 = scalar_lea.hbm %s1416_s1, 256 }
  0x3c   :  { %p1012_p10 = scmp.ne.s32.totalorder %s1416_s1, %s1011_s24  ;;  %p1015_p11 = scmp.lt.u32.totalorder %s1011_s24, %s1416_s1 }
  0x3e   :  { %p1017_p12 = pnand %p1015_p11, %p1012_p10 }
  0x40   :  { %1020 = shalt.err (!%p1017_p12)
}
  0x41   :  { %s1021_s28 = scalar_lea.vmem %s1260_s7, 256  ;;  %p1026_p0 = scmp.lt.s32.totalorder %s1260_s7, %s1260_s7 }
  0x42   :  { %p1022_p13 = scmp.ne.s32.totalorder %s1260_s7, %s1021_s28  ;;  %p1027_p1 = scmp.lt.s32.totalorder %s1021_s28, %s1021_s28 }
  0x44   :  { %p1028_p2 = por %p1027_p1, %p1026_p0 }
  0x46   :  { %p1029_p3 = pnand %p1028_p2, %p1022_p13 }
  0x48   :  { %1032 = shalt.err (!%p1029_p3)
}
  0x49   :  { %38 = dma.hbm_to_vmem [thread:$0]  %s1416_s1, 256, %s1260_s7, [#allocation4], %s1157_s30, %s1157_s30, %s1158_s12  }
  0x4a   :  { %s1161_s29 = smov [#allocation8]   ;;  %s1162_s14 = smov [#allocation11]  }
  0x4b   :  { %s57_s13 = sshll.u32 %s1161_s29, 4  ;;  %s77_s15 = sshll.u32 %s1162_s14, 4  ;;  %s58_s13 = int_to_ptr.vmem [resolvable:$true] %s57_s13  ;;  %s78_s15 = int_to_ptr.vmem [resolvable:$true] %s77_s15 }
  0x4c   :  { %s1033_s4 = scalar_lea.hbm %s1418_s3, 32 }
  0x4d   :  { %p1034_p4 = scmp.ne.s32.totalorder %s1418_s3, %s1033_s4  ;;  %p1037_p5 = scmp.lt.u32.totalorder %s1033_s4, %s1418_s3 }
  0x4f   :  { %p1039_p6 = pnand %p1037_p5, %p1034_p4 }
  0x51   :  { %1042 = shalt.err (!%p1039_p6)
}
  0x52   :  { %s1043_s1 = scalar_lea.vmem %s58_s13, 32  ;;  %p1048_p8 = scmp.lt.s32.totalorder %s58_s13, %s58_s13 }
  0x53   :  { %p1044_p7 = scmp.ne.s32.totalorder %s58_s13, %s1043_s1  ;;  %p1049_p9 = scmp.lt.s32.totalorder %s1043_s1, %s1043_s1 }
  0x55   :  { %p1050_p10 = por %p1049_p9, %p1048_p8 }
  0x57   :  { %p1051_p11 = pnand %p1050_p10, %p1044_p7 }
  0x59   :  { %1054 = shalt.err (!%p1051_p11)
}
  0x5a   :  { %60 = dma.hbm_to_vmem [thread:$0]  %s1418_s3, 32, %s58_s13, [#allocation7]  }
  0x5b   :  { %s1055_s20 = scalar_lea.hbm %s1420_s5, 16 }
  0x5c   :  { %p1056_p12 = scmp.ne.s32.totalorder %s1420_s5, %s1055_s20  ;;  %p1059_p13 = scmp.lt.u32.totalorder %s1055_s20, %s1420_s5 }
  0x5e   :  { %p1061_p0 = pnand %p1059_p13, %p1056_p12 }
  0x60   :  { %1064 = shalt.err (!%p1061_p0)
}
  0x61   :  { %s1065_s26 = scalar_lea.vmem %s78_s15, 16  ;;  %s1069_s29 = scalar_lea.vmem %s78_s15, 32 }
  0x62   :  { %p1066_p1 = scmp.ne.s32.totalorder %s78_s15, %s1065_s26  ;;  %p1070_p2 = scmp.lt.s32.totalorder %s78_s15, %s78_s15 }
  0x63   :  { %p1071_p3 = scmp.lt.s32.totalorder %s1069_s29, %s1065_s26 }
  0x65   :  { %p1072_p4 = por %p1071_p3, %p1070_p2 }
  0x67   :  { %p1073_p5 = pnand %p1072_p4, %p1066_p1 }
  0x69   :  { %1076 = shalt.err (!%p1073_p5)
}
  0x6a   :  { %80 = dma.hbm_to_vmem [thread:$0]  %s1420_s5, 16, %s78_s15, [#allocation10]  }
  0x6b   :  { %s1163_s14 = smov [#allocation14]   ;;  %s1077_s22 = scalar_lea.hbm %s1423_s8, 512 }
  0x6c   :  { %s98_s16 = sshll.u32 %s1163_s14, 4  ;;  %p1078_p6 = scmp.ne.s32.totalorder %s1423_s8, %s1077_s22  ;;  %s99_s16 = int_to_ptr.vmem [resolvable:$true] %s98_s16 }
  0x6d   :  { %p1081_p7 = scmp.lt.u32.totalorder %s1077_s22, %s1423_s8 }
  0x6f   :  { %p1083_p8 = pnand %p1081_p7, %p1078_p6 }
  0x71   :  { %1086 = shalt.err (!%p1083_p8)
}
  0x72   :  { %s1087_s7 = scalar_lea.vmem %s99_s16, 512  ;;  %p1092_p10 = scmp.lt.s32.totalorder %s99_s16, %s99_s16 }
  0x73   :  { %p1088_p9 = scmp.ne.s32.totalorder %s99_s16, %s1087_s7  ;;  %p1093_p11 = scmp.lt.s32.totalorder %s1087_s7, %s1087_s7 }
  0x75   :  { %p1094_p12 = por %p1093_p11, %p1092_p10 }
  0x77   :  { %p1095_p13 = pnand %p1094_p12, %p1088_p9 }
  0x79   :  { %1098 = shalt.err (!%p1095_p13)
}
  0x7a   :  { %104 = dma.hbm_to_vmem [thread:$0]  %s1423_s8, 512, %s99_s16, [#allocation13], %s1157_s30, %s1157_s30, %s1158_s12  }
  0x7b   :  { %1143 = dma.done.wait [#allocation4], 256  }
  0x7c   :  { %1144 = vsyncadd [#allocation4], 4294967040 }
  0x7d   :  { %1145 = dma.done.wait [#allocation7], 288  }
  0x7e   :  { %1146 = vsyncadd [#allocation7], 4294967008 }
  0x7f   :  { %1147 = dma.done.wait [#allocation10], 48  }
  0x80   :  { %1148 = vsyncadd [#allocation10], 4294967248 }
  0x81   :  { %1149 = dma.done.wait [#allocation13], 528  }
  0x82   :  { %1150 = vsyncadd [#allocation13], 4294966768  ;;  %v164_v1 = vlaneseq  ;;  %v1164_v2 = vmov 0   ;;  %v130_v6 = vld [vmem:[#allocation3 + $0x8] sm:$0xff]  ;;  %v841_v7 = vld [vmem:[#allocation12] ss:$0 sm:$0xff] }
  0x83   :  { %937 = vset.pattern.permute.xlu1 %v1164_v2  ;;  %938 = vset.pattern.permute.xlu0 %v1164_v2  ;;  %vm156_vm0 = vcmask 261120   ;;  %v128_v8 = vld [vmem:[%s1415_s0] sm:$0x3]  ;;  %v155_v9 = vmul.f32 %v841_v7, %v130_v6  ;;  %v840_v10 = vld [vmem:[#allocation11] ss:$0 sm:$0xff]  ;;  %vm144_vm1 = vcmask 254976  }
  0x84   :  { %v165_v3 = vshrl.u32 %v164_v1, 7  ;;  %v218_v4 = vand.u32 127, %v164_v1  ;;  %v129_v11 = vld [vmem:[#allocation3] sm:$0xff]  ;;  %v143_v12 = vmul.f32 %v840_v10, %v128_v8  ;;  %v842_v21 = vld [vmem:[#allocation2] ss:$0 sm:$0xff]  ;;  %vm227_vm2 = vcmask 1041409  }
  0x85   :  { %v154_v13 = vmul.f32 %v841_v7, %v129_v11  ;;  %v160_v14 = vsel %vm156_vm0, %v155_v9, 0.0  ;;  %v133_v17 = vld [vmem:[#allocation8] sm:$0x3]  ;;  %vm230_vm3 = vcmask 58368   ;;  %v134_v54 = vld [vmem:[#allocation9] sm:$0x3] }
  0x86   :  { %v1333_v5 = vsub.s32 %v218_v4, %v165_v3  ;;  %161 = vadd.xlane.f32.xlu1 %v160_v14  ;;  %v145_v15 = vsel %vm144_vm1, %v143_v12, 0.0  ;;  %v188_v18 = vsub.f32 1.0, %v133_v17  ;;  %v1341_v19 = vsub.s32 1, %v165_v3  ;;  %v132_v10 = vld [vmem:[#allocation6 + $0x8] sm:$0xff] }
  0x87   :  { %146 = vadd.xlane.f32.xlu0 %v145_v15  ;;  %v157_v16 = vsel %vm156_vm0, %v154_v13, 0.0  ;;  %v166_v23 = vsub.s32 0, %v165_v3  ;;  %v1165_v11 = vmov 0.0   ;;  %vm1166_vm4 = vmmov 0   ;;  %v131_v13 = vld [vmem:[#allocation6] sm:$0xff] }
  0x88   :  { %v189_v20 = vmul.f32 1e+30, %v188_v18  ;;  %v297_v55 = vrot.slane %v134_v54, %v1341_v19  ;;  %872 = vmatprep.subr.mxu1 %v1165_v11  ;;  %874 = vmatprep.mubr.msk.f32.mxu1 %vm1166_vm4, %v1165_v11  ;;  %vm315_vm5 = vcmask 64512  }
  0x89   :  { %v290_v62 = vrot.slane %v134_v54, %v166_v23  ;;  %873 = vmatpush3.msra.mxu1 %v132_v10  ;;  %867 = vmatprep.subr.mxu0 %v1165_v11 }
  0x8a   :  { %v201_v22 = vrot.slane %v189_v20, %v1341_v19  ;;  %v194_v24 = vrot.slane %v189_v20, %v166_v23  ;;  %882 = vmatprep.subr.mxu1 %v1165_v11  ;;  %869 = vmatprep.mubr.msk.f32.mxu0 %vm1166_vm4, %v1165_v11 }
  0x8b   :  { %158 = vadd.xlane.f32.xlu0 %v157_v16  ;;  %868 = vmatpush3.msra.mxu0 %v131_v13 }
  0x8c   :  { %877 = vmatprep.subr.mxu0 %v1165_v11 }
  0x97   :  { %183 = vperm.xlu1 %937, %v842_v21   ;;  %v628_v21 = vld [vmem:[#allocation14] sm:$0xff] }
  0x9b   :  { %203 = vbcast.lane.b32.xlu1 %v201_v22, 256  ;;  %v629_v22 = vld [vmem:[#allocation14 + $0x8] sm:$0xff] }
  0xa1   :  { %196 = vbcast.lane.b32.xlu0 %v194_v24, 256 }
 0x113   :  { %v162_v25 = vpop.xlane.xlu1 %161 }
 0x114   :  { %v147_v26 = vpop.xlane.xlu0 %146 }
 0x115   :  { %v167_v27 = vrot.slane %v147_v26, %v166_v23  ;;  %v171_v28 = vrot.slane %v147_v26, %v1341_v19 }
 0x117   :  { %v184_v29 = vpop.permute.xlu1 %183  ;;  %v175_v32 = vadd.f32 %v171_v28, %v162_v25  ;;  %v916_v25 = vpack.c.bf16 %v629_v22, %v628_v21 }
 0x118   :  { %v159_v30 = vpop.xlane.xlu0 %158 }
 0x119   :  { %v174_v31 = vadd.f32 %v167_v27, %v159_v30  ;;  %v187_v37 = vadd.f32 %v184_v29, %v175_v32  ;;  %v632_v32 = vld [vmem:[%s1424_s9] sm:$0xff] }
 0x11b   :  { %v186_v33 = vadd.f32 %v184_v29, %v174_v31  ;;  %v204_v36 = vpop.permute.xlu1 %203 }
 0x11c   :  { %v197_v34 = vpop.permute.xlu0 %196  ;;  %v208_v38 = vsub.f32 %v187_v37, %v204_v36  ;;  %v631_v36 = vld [vmem:[#allocation14 + $0x18] sm:$0xff] }
 0x11d   :  { %v207_v35 = vsub.f32 %v186_v33, %v197_v34  ;;  %v633_v33 = vld [vmem:[%s1424_s9 + $0x8] sm:$0xff]  ;;  %v630_v34 = vld [vmem:[#allocation14 + $0x10] sm:$0xff] }
 0x11e   :  { %v919_v37 = vpack.c.bf16 %v631_v36, %v630_v34 }
 0x11f   :  { %212 = vperm.xlu1 %937, %v207_v35  }
 0x123   :  { %215 = vperm.xlu1 %937, %v208_v38  }
 0x19e   :  { %v213_v39 = vpop.permute.xlu1 %212 }
 0x19f   :  { %v222_v41 = vrot.slane %v213_v39, %v1333_v5 }
 0x1a2   :  { %v216_v40 = vpop.permute.xlu1 %215 }
 0x1a3   :  { %v226_v42 = vrot.slane %v216_v40, %v1333_v5 }
 0x1a5   :  { %v228_v43 = vsel %vm227_vm2, %v226_v42, %v222_v41 }
 0x1a6   :  { %v231_v44 = vsel %vm230_vm3, %v228_v43, -inf }
 0x1a7   :  { %232 = vmax.xlane.f32.xlu0 %v231_v44 }
 0x1bd   :  { %299 = vbcast.lane.b32.xlu0 %v297_v55, 256 }
 0x234   :  { %v233_v45 = vpop.xlane.xlu0 %232 }
 0x235   :  { %v238_v46 = vrot.slane %v233_v45, %v166_v23  ;;  %v242_v47 = vrot.slane %v233_v45, %v1341_v19 }
 0x237   :  { %v245_v48 = vsub.f32 %v207_v35, %v238_v46  ;;  %v246_v49 = vsub.f32 %v208_v38, %v242_v47  ;;  %v910_v35 = vpack.c.bf16 %v633_v33, %v632_v32  ;;  %v635_v38 = vld [vmem:[%s1424_s9 + $0x18] sm:$0xff] }
 0x238   :  { %v300_v3 = vpop.permute.xlu0 %299 }
 0x239   :  { %v247_v50 = vmul.f32 1.442695, %v245_v48  ;;  %v249_v51 = vmul.f32 1.442695, %v246_v49 }
 0x23b   :  { %939 = vpow2.f32 %v247_v50 }
 0x23c   :  { %941 = vpow2.f32 %v249_v51 }
 0x245   :  { %v940_v52 = vpop.eup %939 }
 0x246   :  { %254 = vperm.xlu1 %937, %v940_v52   ;;  %v942_v53 = vpop.eup %941 }
 0x24a   :  { %257 = vperm.xlu1 %937, %v942_v53  }
 0x2c5   :  { %v255_v56 = vpop.permute.xlu1 %254 }
 0x2c6   :  { %v262_v58 = vrot.slane %v255_v56, %v1333_v5 }
 0x2c9   :  { %v258_v57 = vpop.permute.xlu1 %257 }
 0x2ca   :  { %v266_v59 = vrot.slane %v258_v57, %v1333_v5 }
 0x2cc   :  { %v267_v60 = vsel %vm227_vm2, %v266_v59, %v262_v58 }
 0x2cd   :  { %v269_v61 = vsel %vm230_vm3, %v267_v60, 0.0 }
 0x2ce   :  { %270 = vadd.xlane.f32.xlu1 %v269_v61 }
 0x2df   :  { %292 = vbcast.lane.b32.xlu1 %v290_v62, 256 }
 0x35b   :  { %v271_v63 = vpop.xlane.xlu1 %270 }
 0x35c   :  { %943 = vrcp.f32 %v271_v63 }
 0x35f   :  { %v293_v8 = vpop.permute.xlu1 %292 }
 0x366   :  { %v944_v0 = vpop.eup %943 }
 0x367   :  { %v277_v1 = vrot.slane %v944_v0, %v166_v23  ;;  %v281_v2 = vrot.slane %v944_v0, %v1341_v19  ;;  %v1167_v23 = vmov 0.0|0.0  }
 0x369   :  { %v285_v4 = vmul.f32 %v942_v53, %v281_v2  ;;  %v284_v6 = vmul.f32 %v940_v52, %v277_v1 }
 0x36b   :  { %v304_v7 = vmul.f32 %v300_v3, %v285_v4  ;;  %v303_v12 = vmul.f32 %v293_v8, %v284_v6 }
 0x36d   :  { %v306_v9 = vsub.f32 %v285_v4, %v304_v7  ;;  %390 = vperm.xlu0 %938, %v304_v7   ;;  %v305_v14 = vsub.f32 %v284_v6, %v303_v12 }
 0x36f   :  { %550 = vperm.xlu1 %937, %v306_v9  }
 0x371   :  { %309 = vperm.xlu0 %938, %v303_v12  }
 0x373   :  { %791 = vperm.xlu1 %937, %v284_v6  }
 0x375   :  { %470 = vperm.xlu0 %938, %v305_v14  }
 0x379   :  { %794 = vperm.xlu0 %938, %v285_v4  }
 0x3ec   :  { %v391_v15 = vpop.permute.xlu0 %390 }
 0x3ed   :  { %v395_v16 = vrot.slane %v391_v15, %v1333_v5 }
 0x3ee   :  { %v551_v17 = vpop.permute.xlu1 %550 }
 0x3ef   :  { %875 = vmatmul.mubr.msk.f32.vlgmr.msra.gmra.mrb[0].mxu1 %vm315_vm5, %v395_v16  ;;  %v555_v19 = vrot.slane %v551_v17, %v1333_v5 }
 0x3f0   :  { %v310_v18 = vpop.permute.xlu0 %309  ;;  %883 = vmatpush3.msra.mxu1 %v132_v10  ;;  %884 = vmatprep.mubr.msk.f32.mxu1 %vm1166_vm4, %v1165_v11 }
 0x3f1   :  { %v314_v20 = vrot.slane %v310_v18, %v1333_v5  ;;  %909 = vmatprep.subr.bf16.mxu1 %v1167_v23 }
 0x3f2   :  { %v792_v27 = vpop.permute.xlu1 %791 }
 0x3f3   :  { %870 = vmatmul.mubr.msk.f32.vlgmr.msra.gmra.mrb[0].mxu0 %vm315_vm5, %v314_v20  ;;  %885 = vmatmul.mubr.msk.f32.vlgmr.msra.gmra.mrb[2].mxu1 %vm315_vm5, %v555_v19  ;;  %v799_v29 = vrot.slane %v792_v27, %v1333_v5 }
 0x3f4   :  { %878 = vmatpush3.msra.mxu0 %v131_v13  ;;  %v471_v24 = vpop.permute.xlu0 %470  ;;  %879 = vmatprep.mubr.msk.f32.mxu0 %vm1166_vm4, %v1165_v11 }
 0x3f5   :  { %v475_v26 = vrot.slane %v471_v24, %v1333_v5  ;;  %915 = vmatprep.subr.bf16.mxu0 %v1167_v23  ;;  %895 = vmatprep.mubr.msk.f32.mxu1 %vm1166_vm4, %v1165_v11 }
 0x3f6   :  { %911 = vmatpush3.bf16.msra.mxu1 %v910_v35 }
 0x3f7   :  { %880 = vmatmul.mubr.msk.f32.vlgmr.msra.gmra.mrb[2].mxu0 %vm315_vm5, %v475_v26  ;;  %912 = vmatprep.subr.bf16.mxu1 %v1167_v23 }
 0x3f8   :  { %v795_v28 = vpop.permute.xlu0 %794  ;;  %917 = vmatpush3.bf16.msra.mxu0 %v916_v25  ;;  %906 = vmatprep.mubr.msk.f32.mxu0 %vm1166_vm4, %v1165_v11 }
 0x3f9   :  { %v803_v30 = vrot.slane %v795_v28, %v1333_v5  ;;  %918 = vmatprep.subr.bf16.mxu0 %v1167_v23  ;;  %v634_v5 = vld [vmem:[%s1424_s9 + $0x10] sm:$0xff]  ;;  %s1168_s9 = smov [#allocation15]  }
 0x3fa   :  { %v913_v39 = vpack.c.bf16 %v635_v38, %v634_v5  ;;  %s814_s28 = sshll.u32 %s1168_s9, 4  ;;  %s815_s28 = int_to_ptr.vmem [resolvable:$true] %s814_s28 }
 0x3fb   :  { %v804_v31 = vsel %vm227_vm2, %v803_v30, %v799_v29  ;;  %s1099_s6 = scalar_lea.vmem %s815_s28, 32  ;;  %p1104_p1 = scmp.lt.s32.totalorder %s815_s28, %s815_s28 }
 0x3fc   :  { %806 = vst.msk [vmem:[#allocation15] sm:$0x3] %vm230_vm3, %v804_v31  ;;  %920 = vmatpush3.bf16.msra.mxu0 %v919_v37  ;;  %914 = vmatpush3.bf16.msra.mxu1 %v913_v39  ;;  %p1100_p0 = scmp.ne.s32.totalorder %s815_s28, %s1099_s6  ;;  %p1105_p2 = scmp.lt.s32.totalorder %s1099_s6, %s1099_s6 }
 0x3fe   :  { %p1106_p3 = por %p1105_p2, %p1104_p1 }
 0x400   :  { %p1107_p4 = pnand %p1106_p3, %p1100_p0 }
 0x4c2   :  { %v464_v40 = vpop.f32.mrb[0].mxu1 }
 0x4c3   :  { %v876_v41 = vpop.f32.mrb[1].mxu1  ;;  %v714_v42 = vrot.slane %v464_v40, 7 }
 0x4c6   :  { %v384_v43 = vpop.f32.mrb[0].mxu0  ;;  %v624_v44 = vpop.f32.mrb[2].mxu1 }
 0x4c7   :  { %v715_v45 = vsel %vm227_vm2, %v714_v42, %v384_v43  ;;  %v871_v46 = vpop.f32.mrb[1].mxu0  ;;  %v886_v47 = vpop.f32.mrb[3].mxu1  ;;  %v638_v48 = vrot.slane %v624_v44, 7 }
 0x4c8   :  { %907 = vmatmul.mubr.msk.f32.vlgmr.msra.gmra.mrb[4].mxu0 %vm156_vm0, %v715_v45 }
 0x4ca   :  { %v544_v49 = vpop.f32.mrb[2].mxu0 }
 0x4cb   :  { %v639_v50 = vsel %vm227_vm2, %v638_v48, %v544_v49  ;;  %v881_v51 = vpop.f32.mrb[3].mxu0 }
 0x4cc   :  { %896 = vmatmul.mubr.msk.f32.vlgmr.msra.gmra.mrb[4].mxu1 %vm156_vm0, %v639_v50 }
 0x4cd   :  { %1110 = shalt.err (!%p1107_p4)
}
 0x4ce   :  { %s1111_s3 = scalar_lea.hbm %s1425_s10, 32 }
 0x4cf   :  { %p1112_p5 = scmp.ne.s32.totalorder %s1425_s10, %s1111_s3  ;;  %p1115_p6 = scmp.lt.u32.totalorder %s1111_s3, %s1425_s10 }
 0x4d1   :  { %p1117_p7 = pnand %p1115_p6, %p1112_p5 }
 0x4d3   :  { %1120 = shalt.err (!%p1117_p7)
}
 0x4d4   :  { %817 = dma.vmem_to_hbm [thread:$0]  %s815_s28, 32, %s1425_s10, [#allocation5]  }
 0x4d5   :  { %s1169_s18 = smov [#allocation16]  }
 0x4d6   :  { %s824_s19 = sshll.u32 %s1169_s18, 4  ;;  %s825_s19 = int_to_ptr.vmem [resolvable:$true] %s824_s19 }
 0x4d7   :  { %s1121_s21 = scalar_lea.vmem %s825_s19, 32  ;;  %p1126_p9 = scmp.lt.s32.totalorder %s825_s19, %s825_s19 }
 0x4d8   :  { %p1122_p8 = scmp.ne.s32.totalorder %s825_s19, %s1121_s21  ;;  %p1127_p10 = scmp.lt.s32.totalorder %s1121_s21, %s1121_s21 }
 0x4da   :  { %p1128_p11 = por %p1127_p10, %p1126_p9 }
 0x4dc   :  { %p1129_p12 = pnand %p1128_p11, %p1122_p8 }
 0x59b   :  { %v784_v52 = vpop.f32.mrb[4].mxu0 }
 0x59c   :  { %v908_v53 = vpop.f32.mrb[5].mxu0 }
 0x59f   :  { %v708_v54 = vpop.f32.mrb[4].mxu1 }
 0x5a0   :  { %v785_v55 = vadd.f32 %v784_v52, %v708_v54  ;;  %v897_v56 = vpop.f32.mrb[5].mxu1 }
 0x5a2   :  { %807 = vst.msk [vmem:[#allocation16] sm:$0x3] %vm144_vm1, %v785_v55 }
 0x5a3   :  { %1132 = shalt.err (!%p1129_p12)
}
 0x5a4   :  { %s1133_s10 = scalar_lea.hbm %s1426_s11, 32 }
 0x5a5   :  { %p1134_p13 = scmp.ne.s32.totalorder %s1426_s11, %s1133_s10  ;;  %p1137_p0 = scmp.lt.u32.totalorder %s1133_s10, %s1426_s11 }
 0x5a7   :  { %p1139_p1 = pnand %p1137_p0, %p1134_p13 }
 0x5a9   :  { %1142 = shalt.err (!%p1139_p1)
}
 0x5aa   :  { %827 = dma.vmem_to_hbm [thread:$0]  %s825_s19, 32, %s1426_s11, [#allocation17]  }
 0x5ab   :  { %1151 = dma.done.wait [#allocation5], 32  }
 0x5ac   :  { %1152 = vsyncadd [#allocation5], 4294967264 }
 0x5ad   :  { %1153 = dma.done.wait [#allocation17], 32  }
 0x5ae   :  { %1154 = vsyncadd [#allocation17], 4294967264 }
 0x5af   :  { %834 = vsyncpa [#allocation4], 1 }
 0x5b0   :  { %835 = vsyncpa [#allocation7], 1 }
 0x5b1   :  { %836 = vsyncpa [#allocation10], 1 }
 0x5b2   :  { %837 = vsyncpa [#allocation13], 1 }
 0x5b3   :  { %838 = vsyncpa [#allocation5], 1 }
 0x5b4   :  { %839 = vsyncpa [#allocation17], 1 }

</bundles_post_ra>
